<compile_context>
chip_gen: v5e
topology: v5e:2x2
jax: 0.10.0
libtpu: 0.0.40
codegen_flags: <defaults>
</compile_context>

<pallas_src>
import functools

import jax
import jax.numpy as jnp
from jax.experimental import pallas as pl
from jax.experimental.pallas import tpu as pltpu

_PI = 3.14159  # matches the hard-coded constant inside the torch.jit.script gaussian()
_A = (2.0 * _PI) ** 0.5
_SQRT_HALF = 0.5 ** 0.5


def _round_up(a, b):
    return ((a + b - 1) // b) * b


def _gaussian_kernel(val_ref, a_ref, b_ref, coef_ref, o_ref):
    # val_ref: [TM, 1]; a/b/coef: [1, K]; o_ref: [TM, K]
    # z = sqrt(0.5) * (val - mean) / std  ==  val * a - b
    z = val_ref[...] * a_ref[...] - b_ref[...]                 # broadcast -> [TM, K]
    o_ref[...] = (coef_ref[...] * jnp.exp(-(z * z))).astype(o_ref.dtype)


@functools.partial(jax.jit, static_argnames=("tm",))
def gaussian_layer_pallas(x, edge_type, means_w, stds_w, mul_w, bias_w, tm=8192):
    """x: [B,N,N] float32, edge_type: [B,N,N] int32. Returns [B,N,N,K] (means_w dtype)."""
    B, N, _ = x.shape
    K = means_w.shape[-1]

    # --- glue: embedding gathers + fused FMA + parameter prep (plain JAX) ---
    mul = jnp.take(mul_w[:, 0], edge_type, axis=0).astype(x.dtype)    # [B,N,N]
    bias = jnp.take(bias_w[:, 0], edge_type, axis=0).astype(x.dtype)  # [B,N,N]
    val = (mul * x + bias).astype(jnp.float32)                        # [B,N,N], fuses w/ gathers

    mean = means_w.astype(jnp.float32).reshape(1, K)                  # [1,K]
    std = jnp.abs(stds_w.astype(jnp.float32).reshape(1, K)) + 1e-5    # [1,K]
    inv_std = 1.0 / std                                               # exact, [1,K]
    a = inv_std * _SQRT_HALF                                          # sqrt(.5)/std
    b = (mean * inv_std) * _SQRT_HALF                                 # sqrt(.5)*mean/std
    coef = 1.0 / (_A * std)                                           # 1/(sqrt(2*pi)*std)

    M = B * N * N

    # Tile sizing: big tiles amortize per-step overhead; no padding needed
    # (Pallas masks the ragged final block's output writes).
    tm_eff = max(8, _round_up(min(tm, M), 8))
    # Keep at least 2 grid steps when possible so v7x's two TCs both stream.
    if tm_eff > 8 and pl.cdiv(M, tm_eff) < 2:
        tm_eff = max(8, _round_up(pl.cdiv(M, 2), 8))
    grid = (pl.cdiv(M, tm_eff),)

    val_c = val.reshape(M, 1)              # metadata-only reshape, no pad/copy
    out_dtype = means_w.dtype              # .type_as(self.means.weight)

    out = pl.pallas_call(
        _gaussian_kernel,
        out_shape=jax.ShapeDtypeStruct((M, K), out_dtype),
        grid_spec=pltpu.PrefetchScalarGridSpec(
            num_scalar_prefetch=0,
            grid=grid,
            in_specs=[
                pl.BlockSpec((tm_eff, 1), lambda i: (i, 0)),   # fused val column
                pl.BlockSpec((1, K), lambda i: (0, 0)),        # sqrt(.5)/std       (grid-invariant)
                pl.BlockSpec((1, K), lambda i: (0, 0)),        # sqrt(.5)*mean/std  (grid-invariant)
                pl.BlockSpec((1, K), lambda i: (0, 0)),        # 1/(sqrt(2pi)*std)  (grid-invariant)
            ],
            out_specs=pl.BlockSpec((tm_eff, K), lambda i: (i, 0)),
        ),
        compiler_params=pltpu.CompilerParams(
            dimension_semantics=("parallel",),
            # ~16 MiB live at tm=8192 (double-buffered out tile + lane-padded
            # val column); 32 MiB covers it on every generation incl. v5e's
            # 16 MiB default scoped limit, and stays under v7x's 64 MiB/TC.
            vmem_limit_bytes=32 * 1024 * 1024,
        ),
        cost_estimate=pl.CostEstimate(
            flops=5 * M * K,
            transcendentals=M * K,
            bytes_accessed=4 * M * K + 4 * M + 3 * 4 * K,
        ),
    )(val_c, a, b, coef)

    # Pure metadata reshape; no slice/copy epilogue.
    return out.reshape(B, N, N, K).astype(out_dtype)


def _reference(x, edge_type, means_w, stds_w, mul_w, bias_w):
    K = means_w.shape[-1]
    mul = jnp.take(mul_w[:, 0], edge_type, axis=0).astype(x.dtype)[..., None]
    bias = jnp.take(bias_w[:, 0], edge_type, axis=0).astype(x.dtype)[..., None]
    y = mul * x[..., None] + bias
    y = jnp.broadcast_to(y, y.shape[:-1] + (K,)).astype(jnp.float32)
    mean = means_w.astype(jnp.float32).reshape(-1)
    std = jnp.abs(stds_w.astype(jnp.float32).reshape(-1)) + 1e-5
    return (jnp.exp(-0.5 * ((y - mean) / std) ** 2) / (_A * std)).astype(means_w.dtype)


if __name__ == "__main__":
    K = 128
    edge_types = 1024
    B, N = 2, 8

    key = jax.random.PRNGKey(0)
    k1, k2, k3, k4 = jax.random.split(key, 4)

    # Deterministic parameter init matching nn.init in __init__:
    means_w = jax.random.uniform(k1, (1, K), jnp.float32, 0.0, 3.0)   # uniform(0,3)
    stds_w = jax.random.uniform(k2, (1, K), jnp.float32, 0.0, 3.0)    # uniform(0,3)
    mul_w = jnp.ones((edge_types, 1), jnp.float32)                    # constant 1
    bias_w = jnp.zeros((edge_types, 1), jnp.float32)                  # constant 0

    x = jax.random.normal(k3, (B, N, N), jnp.float32) * 2.0 + 3.0
    edge_type = jax.random.randint(k4, (B, N, N), 0, edge_types, jnp.int32)

    out = gaussian_layer_pallas(x, edge_type, means_w, stds_w, mul_w, bias_w)
    jax.block_until_ready(out)

    ref = _reference(x, edge_type, means_w, stds_w, mul_w, bias_w)
    assert out.shape == (B, N, N, K), out.shape
    assert out.dtype == jnp.float32
    assert jnp.allclose(out, ref, atol=1e-5, rtol=1e-5), float(jnp.max(jnp.abs(out - ref)))

    print("KERNEL_OK")
</pallas_src>

<mosaic_0001>
module attributes {stable_mosaic.version = 11 : i64} {
  func.func @_gaussian_kernel(%arg0: i32, %arg1: memref<64x1xf32, #tpu.memory_space<vmem>>, %arg2: memref<1x128xf32, #tpu.memory_space<vmem>>, %arg3: memref<1x128xf32, #tpu.memory_space<vmem>>, %arg4: memref<1x128xf32, #tpu.memory_space<vmem>>, %arg5: memref<64x128xf32, #tpu.memory_space<vmem>>) attributes {dimension_semantics = [#tpu.dimension_semantics<parallel>], iteration_bounds = array<i64: 2>, scalar_prefetch = 0 : i64, scratch_operands = 0 : i64, tpu.core_type = #tpu.core_type<tc>, window_params = [{transform_indices = @transform_0, window_bounds = array<i64: 64, 1>}, {pipeline_mode = #tpu.pipeline_mode<synchronous>, transform_indices = @transform_1, window_bounds = array<i64: 1, 128>}, {pipeline_mode = #tpu.pipeline_mode<synchronous>, transform_indices = @transform_2, window_bounds = array<i64: 1, 128>}, {pipeline_mode = #tpu.pipeline_mode<synchronous>, transform_indices = @transform_3, window_bounds = array<i64: 1, 128>}, {transform_indices = @transform_4, window_bounds = array<i64: 64, 128>}]} {
    %c0 = arith.constant 0 : index
    %c0_0 = arith.constant 0 : index
    %0 = vector.load %arg1[%c0, %c0_0] : memref<64x1xf32, #tpu.memory_space<vmem>>, vector<64x1xf32>
    %c0_1 = arith.constant 0 : index
    %c0_2 = arith.constant 0 : index
    %1 = vector.load %arg2[%c0_1, %c0_2] : memref<1x128xf32, #tpu.memory_space<vmem>>, vector<1x128xf32>
    %2 = vector.broadcast %0 : vector<64x1xf32> to vector<64x128xf32>
    %3 = vector.broadcast %1 : vector<1x128xf32> to vector<64x128xf32>
    %4 = arith.mulf %2, %3 : vector<64x128xf32>
    %c0_3 = arith.constant 0 : index
    %c0_4 = arith.constant 0 : index
    %5 = vector.load %arg3[%c0_3, %c0_4] : memref<1x128xf32, #tpu.memory_space<vmem>>, vector<1x128xf32>
    %6 = vector.broadcast %5 : vector<1x128xf32> to vector<64x128xf32>
    %7 = arith.subf %4, %6 : vector<64x128xf32>
    %c0_5 = arith.constant 0 : index
    %c0_6 = arith.constant 0 : index
    %8 = vector.load %arg4[%c0_5, %c0_6] : memref<1x128xf32, #tpu.memory_space<vmem>>, vector<1x128xf32>
    %9 = arith.mulf %7, %7 : vector<64x128xf32>
    %cst = arith.constant 0.000000e+00 : f32
    %10 = vector.broadcast %cst : f32 to vector<64x128xf32>
    %11 = arith.subf %10, %9 : vector<64x128xf32>
    %12 = math.exp %11 : vector<64x128xf32>
    %13 = vector.broadcast %8 : vector<1x128xf32> to vector<64x128xf32>
    %14 = arith.mulf %13, %12 : vector<64x128xf32>
    %c0_7 = arith.constant 0 : index
    %c0_8 = arith.constant 0 : index
    %15 = vector.load %arg5[%c0_7, %c0_8] : memref<64x128xf32, #tpu.memory_space<vmem>>, vector<64x128xf32>
    tpu.vector_store %arg5[%c0_7, %c0_8], %14 {strides = array<i32>} : memref<64x128xf32, #tpu.memory_space<vmem>>, vector<64x128xf32>,
    return
  }
  func.func @transform_0(%arg0: i32) -> (i32, i32) {
    %c0_i32 = arith.constant 0 : i32
    %c0_i32_0 = arith.constant 0 : i32
    return %arg0, %c0_i32 : i32, i32
  }
  func.func @transform_1(%arg0: i32) -> (i32, i32) {
    %c0_i32 = arith.constant 0 : i32
    %c0_i32_0 = arith.constant 0 : i32
    %c0_i32_1 = arith.constant 0 : i32
    return %c0_i32, %c0_i32_0 : i32, i32
  }
  func.func @transform_2(%arg0: i32) -> (i32, i32) {
    %c0_i32 = arith.constant 0 : i32
    %c0_i32_0 = arith.constant 0 : i32
    %c0_i32_1 = arith.constant 0 : i32
    return %c0_i32, %c0_i32_0 : i32, i32
  }
  func.func @transform_3(%arg0: i32) -> (i32, i32) {
    %c0_i32 = arith.constant 0 : i32
    %c0_i32_0 = arith.constant 0 : i32
    %c0_i32_1 = arith.constant 0 : i32
    return %c0_i32, %c0_i32_0 : i32, i32
  }
  func.func @transform_4(%arg0: i32) -> (i32, i32) {
    %c0_i32 = arith.constant 0 : i32
    %c0_i32_0 = arith.constant 0 : i32
    return %arg0, %c0_i32 : i32, i32
  }
}

</mosaic_0001>

<bundles_post_ra>
// kernel: gaussian_layer_pallas.1
= control target key start
LH: loop header
LB: loop body
LE: loop exit
PB: predicated region body
PF: predicated region fallthrough
CT: control target
= control target key end

     0   :  { %9 = vsyncpa [#allocation3], 0  ;;  %s688_s0 = inlined_call_operand.vmem [shape: f32[128,1], index: 0, kind: input, shape index: {}]   ;;  %s689_s1 = inlined_call_operand.vmem [shape: f32[1,128], index: 1, kind: input, shape index: {}]   ;;  %s690_s2 = inlined_call_operand.vmem [shape: f32[1,128], index: 2, kind: input, shape index: {}]   ;;  %s691_s3 = inlined_call_operand.vmem [shape: f32[1,128], index: 3, kind: input, shape index: {}]   ;;  %s692_s4 = inlined_call_operand.hbm [shape: f32[128,128], index: 4, kind: output, shape index: {}]  }
   0x1   :  { %11 = vsyncpa [#allocation3 + $0x1], 0  ;;  %s570_s15 = smov 0   ;;  %s572_s16 = smov 0  }
   0x2   :  { %s574_s17 = smov 0   ;;  %s576_s18 = smov 0  }
   0x3 LB: > { %s591_s19 = sadd.s32 4294967295, %s540_s18   ;;  %s401_s20 = sadd.s32 4294967294, %s540_s18   ;;  %s540_s18 = sphi %s576_s18, %s698_s18   ;;  %s536_s17 = sphi %s574_s17, %s697_s17   ;;  %s532_s16 = sphi %s572_s16, %s696_s16   ;;  %s528_s15 = sphi %s570_s15, %s695_s15  }
   0x4   : > { %s595_s21 = sadd.s32 1, %s540_s18   ;;  %s113_s22 = sadd.s32 1, %s536_s17 }
   0x5   : > { %s110_s23 = ssub.s32 %s540_s18, %s595_s21  ;;  %p123_p0 = scmp.ne.s32.totalorder %s536_s17, %s532_s16 }
   0x6   : > { %p111_p1 = scmp.eq.s32.totalorder %s110_s23, 0  ;;  %p124_p2 = scmp.eq.s32.totalorder %s591_s19, 1 }
   0x7   : > { %p129_p3 = scmp.ne.s32.totalorder %s532_s16, %s528_s15  ;;  %p130_p4 = scmp.eq.s32.totalorder %s401_s20, 1 }
   0x8   : > { %s606_s24 = scalar_select %p111_p1, %s536_s17, %s113_s22  }
   0x9   : > { %p608_p5 = por %p124_p2, %p123_p0  ;;  %p612_p6 = por %p130_p4, %p129_p3 }
   0xa   : > { %p404_p7 = scmp.ge.s32.totalorder %s540_s18, 1  ;;  %p166_p8 = scmp.lt.s32.totalorder %s540_s18, 3 }
   0xc   : > { %p167_p9 = pnand %p404_p7, %p166_p8 }
   0xd   : > { %s406_s27 = sshll.u32 (!%p167_p9), %s591_s19, 3  ;;  %s189_s10 = sand.u32 (!%p167_p9), 1, %s532_s16  }
   0xe   : > { %170 = sbr.rel (%p167_p9) target bundleno = 178 (0xb2), region = 36  ;;  %p193_p10 = scmp.lt.s32.totalorder (!%p167_p9), %s406_s27, 15 }
   0xf   : > { %s405_s13 = sshll.u32 (!%p167_p9), %s189_s10, 6  ;;  %s413_s20 = sshll.u32 (!%p167_p9), %s591_s19, 6 }
  0x10   : > { %s637_s14 = scalar_lea.vmem (!%p167_p9), [#allocation2], %s405_s13  ;;  %s324_s19 = scalar_lea.sflag (!%p167_p9), [#allocation3], %s189_s10 }
  0x11   : > { %s498_s8 = scalar_lea.hbm (!%p167_p9), %s692_s4, 128 }
  0x13   : > { %v542_v0 = vmov 0   ;;  %s700_s27 = smov (!%p193_p10, %s406_s27), 15  ;;  %v459_v9 = vld [vmem:[%s689_s1] ss:$0 sm:$0xff] }
  0x14   : > { %457 = vset.pattern.permute.xlu1 %v542_v0  ;;  %456 = vset.pattern.permute.xlu0 %v542_v0  ;;  %s407_s28 = sshll.u32 %s700_s27, 3  ;;  %v460_v11 = vld [vmem:[%s690_s2] ss:$0 sm:$0xff]  ;;  %s335_s27 = scalar_lea.hbm %s692_s4, %s413_s20 }
  0x15   : > { %458 = vset.pattern.permute.xlu2 %v542_v0  ;;  %s196_s5 = scalar_lea.vmem %s688_s0, %s407_s28  ;;  %v632_v22 = vld [vmem:[%s691_s3] ss:$0 sm:$0xff]  ;;  %s336_s28 = sshll.u32 %s637_s14, 4  ;;  %s337_s28 = int_to_ptr.vmem [resolvable:$true] %s336_s28 }
  0x16   : > { %v201_v1 = vld [vmem:[%s196_s5 + $0x10] sm:$0xff]  ;;  %v199_v2 = vld [vmem:[%s196_s5] sm:$0xff]  ;;  %v202_v4 = vld [vmem:[%s196_s5 + $0x18] sm:$0xff]  ;;  %s338_s29 = sshll.u32 %s335_s27, 4  ;;  %s339_s29 = int_to_ptr.hbm [resolvable:$true] %s338_s29 }
  0x17   : > { %220 = vperm.xlu1 %457, %v201_v1   ;;  %210 = vperm.xlu0 %456, %v199_v2   ;;  %v203_v3 = vld [vmem:[%s196_s5 + $0x20] sm:$0xff]  ;;  %v200_v5 = vld [vmem:[%s196_s5 + $0x8] sm:$0xff]  ;;  %v206_v7 = vld [vmem:[%s196_s5 + $0x38] sm:$0xff]  ;;  %s492_s30 = sshra.s32 %s339_s29, 4  ;;  %s493_s30 = int_to_ptr.hbm [resolvable:$true] %s492_s30 }
  0x18   : > { %230 = vperm.xlu2 %458, %v203_v3   ;;  %v204_v6 = vld [vmem:[%s196_s5 + $0x28] sm:$0xff]  ;;  %v205_v8 = vld [vmem:[%s196_s5 + $0x30] sm:$0xff]  ;;  %s494_s5 = scalar_lea.hbm %s493_s30, 64  ;;  %p499_p0 = scmp.lt.s32.totalorder %s493_s30, %s692_s4 }
  0x19   : > { %p495_p11 = scmp.ne.s32.totalorder %s493_s30, %s494_s5  ;;  %p500_p1 = scmp.lt.s32.totalorder %s498_s8, %s494_s5 }
  0x1b   : > { %p496_p12 = pnand %p495_p11, %p608_p5  ;;  %p501_p2 = por %p500_p1, %p499_p0 }
  0x1d   : > { %p497_p13 = pneg %p496_p12 }
  0x1f   : > { %225 = vperm.xlu1 %457, %v202_v4   ;;  %215 = vperm.xlu0 %456, %v200_v5   ;;  %p502_p3 = pnand %p501_p2, %p497_p13 }
  0x20   : > { %235 = vperm.xlu2 %458, %v204_v6  }
  0x27   : > { %245 = vperm.xlu1 %457, %v206_v7   ;;  %240 = vperm.xlu0 %456, %v205_v8  }
  0x72   : > { %v231_v10 = vpop.permute.xlu2 %230 }
  0x73   : > { %v255_v12 = vmul.f32 %v459_v9, %v231_v10 }
  0x75   : > { %v267_v13 = vsub.f32 %v255_v12, %v460_v11 }
  0x77   : > { %v276_v14 = vmul.f32 %v267_v13, %v267_v13 }
  0x79   : > { %v284_v15 = vsub.f32 0.0, %v276_v14 }
  0x7a   : > { %v236_v16 = vpop.permute.xlu2 %235 }
  0x7b   : > { %v296_v17 = vmul.f32 1.442695, %v284_v15  ;;  %v256_v18 = vmul.f32 %v459_v9, %v236_v16 }
  0x7d   : > { %462 = vpow2.f32 %v296_v17  ;;  %v268_v19 = vsub.f32 %v256_v18, %v460_v11 }
  0x7f   : > { %v277_v20 = vmul.f32 %v268_v19, %v268_v19 }
  0x81   : > { %v285_v21 = vsub.f32 0.0, %v277_v20 }
  0x83   : > { %v463_v23 = vpop.eup %462  ;;  %v298_v24 = vmul.f32 1.442695, %v285_v21 }
  0x84   : > { %v311_v25 = vmul.f32 %v463_v23, %v632_v22 }
  0x85   : > { %464 = vpow2.f32 %v298_v24 }
  0x86   : > { %319 = vst [vmem:[%s637_s14 + $0x20] sm:$0xff] %v311_v25 }
  0x89   : > { %v221_v26 = vpop.permute.xlu1 %220  ;;  %v211_v27 = vpop.permute.xlu0 %210 }
  0x8a   : > { %v253_v28 = vmul.f32 %v459_v9, %v221_v26  ;;  %v251_v29 = vmul.f32 %v459_v9, %v211_v27 }
  0x8b   : > { %v465_v30 = vpop.eup %464 }
  0x8c   : > { %v265_v31 = vsub.f32 %v253_v28, %v460_v11  ;;  %v263_v32 = vsub.f32 %v251_v29, %v460_v11  ;;  %v312_v33 = vmul.f32 %v465_v30, %v632_v22 }
  0x8e   : > { %v274_v34 = vmul.f32 %v265_v31, %v265_v31  ;;  %v272_v35 = vmul.f32 %v263_v32, %v263_v32  ;;  %320 = vst [vmem:[%s637_s14 + $0x28] sm:$0xff] %v312_v33 }
  0x90   : > { %v282_v36 = vsub.f32 0.0, %v274_v34  ;;  %v280_v37 = vsub.f32 0.0, %v272_v35 }
  0x91   : > { %v226_v38 = vpop.permute.xlu1 %225  ;;  %v216_v39 = vpop.permute.xlu0 %215 }
  0x92   : > { %v292_v40 = vmul.f32 1.442695, %v282_v36  ;;  %v288_v41 = vmul.f32 1.442695, %v280_v37  ;;  %v254_v42 = vmul.f32 %v459_v9, %v226_v38  ;;  %v252_v43 = vmul.f32 %v459_v9, %v216_v39 }
  0x94   : > { %466 = vpow2.f32 %v292_v40  ;;  %v266_v44 = vsub.f32 %v254_v42, %v460_v11  ;;  %v264_v45 = vsub.f32 %v252_v43, %v460_v11 }
  0x95   : > { %468 = vpow2.f32 %v288_v41 }
  0x96   : > { %v275_v46 = vmul.f32 %v266_v44, %v266_v44  ;;  %v273_v47 = vmul.f32 %v264_v45, %v264_v45 }
  0x98   : > { %v283_v48 = vsub.f32 0.0, %v275_v46  ;;  %v281_v49 = vsub.f32 0.0, %v273_v47 }
  0x99   : > { %v246_v50 = vpop.permute.xlu1 %245  ;;  %v241_v51 = vpop.permute.xlu0 %240 }
  0x9a   : > { %v467_v52 = vpop.eup %466  ;;  %v294_v53 = vmul.f32 1.442695, %v283_v48  ;;  %v290_v54 = vmul.f32 1.442695, %v281_v49  ;;  %v258_v55 = vmul.f32 %v459_v9, %v246_v50  ;;  %v257_v56 = vmul.f32 %v459_v9, %v241_v51 }
  0x9b   : > { %v469_v57 = vpop.eup %468  ;;  %v309_v58 = vmul.f32 %v467_v52, %v632_v22 }
  0x9c   : > { %v307_v59 = vmul.f32 %v469_v57, %v632_v22  ;;  %470 = vpow2.f32 %v294_v53  ;;  %v270_v60 = vsub.f32 %v258_v55, %v460_v11  ;;  %v269_v61 = vsub.f32 %v257_v56, %v460_v11 }
  0x9d   : > { %317 = vst [vmem:[%s637_s14 + $0x10] sm:$0xff] %v309_v58  ;;  %472 = vpow2.f32 %v290_v54 }
  0x9e   : > { %315 = vst [vmem:[%s637_s14] sm:$0xff] %v307_v59  ;;  %v279_v62 = vmul.f32 %v270_v60, %v270_v60  ;;  %v278_v63 = vmul.f32 %v269_v61, %v269_v61 }
  0xa0   : > { %v287_v0 = vsub.f32 0.0, %v279_v62  ;;  %v286_v1 = vsub.f32 0.0, %v278_v63 }
  0xa2   : > { %v471_v2 = vpop.eup %470  ;;  %v302_v3 = vmul.f32 1.442695, %v287_v0  ;;  %v300_v4 = vmul.f32 1.442695, %v286_v1 }
  0xa3   : > { %v473_v5 = vpop.eup %472  ;;  %v310_v6 = vmul.f32 %v471_v2, %v632_v22 }
  0xa4   : > { %v308_v7 = vmul.f32 %v473_v5, %v632_v22  ;;  %474 = vpow2.f32 %v302_v3 }
  0xa5   : > { %318 = vst [vmem:[%s637_s14 + $0x18] sm:$0xff] %v310_v6  ;;  %476 = vpow2.f32 %v300_v4 }
  0xa6   : > { %316 = vst [vmem:[%s637_s14 + $0x8] sm:$0xff] %v308_v7 }
  0xaa   : > { %v475_v8 = vpop.eup %474 }
  0xab   : > { %v477_v9 = vpop.eup %476  ;;  %v314_v10 = vmul.f32 %v475_v8, %v632_v22 }
  0xac   : > { %v313_v11 = vmul.f32 %v477_v9, %v632_v22 }
  0xad   : > { %322 = vst [vmem:[%s637_s14 + $0x38] sm:$0xff] %v314_v10 }
  0xae   : > { %321 = vst [vmem:[%s637_s14 + $0x30] sm:$0xff] %v313_v11 }
  0xaf   : > { %505 = shalt.err (!%p502_p3)
}
  0xb0   : > { %s543_s10 = smov 128   ;;  %s544_s12 = smov 8  }
  0xb1   : > { %414 = dma.vmem_to_hbm [thread:$0]  (%p608_p5), %s337_s28, 1024, %s339_s29, %s324_s19, %s543_s10, %s543_s10, %s544_s12  }
  0xb2 PF: > { %p420_p4 = scmp.ge.s32.totalorder %s540_s18, 2  ;;  %s353_s13 = sand.u32 1, %s528_s15  }
  0xb3   : > { %s354_s14 = scalar_lea.sflag [#allocation3], %s353_s13 }
  0xb4   : > { %p417_p7 = pnand %p420_p4, %p612_p6 }
  0xb6   : > { %p418_p8 = pneg %p417_p7 }
  0xb8   : > { %523 = dma.done.wait (%p418_p8), %s354_s14, 1024  }
  0xb9   : > { %525 = vsyncadd (%p418_p8), %s354_s14, 4294966272  ;;  %p14_p9 = scmp.ge.s32.totalorder %s595_s21, 4   ;;  %s695_s15 = smov %s532_s16 }
  0xba   : > { %s696_s16 = smov %s536_s17  ;;  %s697_s17 = smov %s606_s24 }
  0xbb   : > { %s698_s18 = smov %s595_s21  ;;  %16 = sbr.rel (!%p14_p9) target bundleno = 3 (0x3), region = 71 }
  0xc0   :  { %360 = vsyncpa [#allocation3], 1 }
  0xc1   :  { %362 = vsyncpa [#allocation3 + $0x1], 1 }

</bundles_post_ra>
